<compile_context>
chip_gen: v7x
topology: tpu7x:2x2x1
jax: 0.10.0
libtpu: 0.0.40
codegen_flags: <defaults>
</compile_context>

<pallas_src>
import functools

import jax
import jax.numpy as jnp
from jax.experimental import pallas as pl
from jax.experimental.pallas import tpu as pltpu


def _round_up(x, m):
    return ((x + m - 1) // m) * m


def _focal_partial_kernel(logits_ref, tgt_ref, sum_ref, cnt_ref, *,
                          ignore_index, hw, tile_hw):
    # logits_ref: (1, C, T) any float dtype; tgt_ref: (1, 1, T) int32
    # sum_ref / cnt_ref: (1, 1, T) f32, resident accumulators across the tile axis.
    j = pl.program_id(1)

    @pl.when(j == 0)
    def _():
        sum_ref[...] = jnp.zeros_like(sum_ref)
        cnt_ref[...] = jnp.zeros_like(cnt_ref)

    x = logits_ref[0].astype(jnp.float32)      # (C, T) — classes on sublanes
    t = tgt_ref[0]                             # (1, T) int32

    # numerically-stable log-sum-exp over the class (sublane) axis
    x_max = jnp.max(x, axis=0, keepdims=True)                               # (1, T)
    lse = x_max + jnp.log(jnp.sum(jnp.exp(x - x_max), axis=0, keepdims=True))

    # gather the target-class logit via a one-hot sublane reduction
    cls = jax.lax.broadcasted_iota(jnp.int32, x.shape, 0)                   # (C, T)
    x_tgt = jnp.sum(jnp.where(cls == t, x, 0.0), axis=0, keepdims=True)     # (1, T)

    # valid-pixel mask: not ignore_index AND inside the (possibly ragged) tile
    pix = j * tile_hw + jax.lax.broadcasted_iota(jnp.int32, t.shape, 1)     # (1, T)
    valid = jnp.logical_and(t != ignore_index, pix < hw)

    per_pix = jnp.where(valid, lse - x_tgt, 0.0)                            # (1, T)
    sum_ref[...] += per_pix.reshape(sum_ref.shape)
    cnt_ref[...] += valid.astype(jnp.float32).reshape(cnt_ref.shape)


def focal_loss(logits_nchw, targets_nhw, *, alpha=0.25, gamma=2,
               ignore_index=6, max_tile_hw=16384):
    """logits_nchw: (N, C, H, W) float (f32 or bf16); targets_nhw: (N, H, W) int."""
    n, c, h, w = logits_nchw.shape
    hw = h * w

    logits = logits_nchw.reshape(n, c, hw)                 # free reshape, no transpose
    targets = targets_nhw.reshape(n, 1, hw).astype(jnp.int32)

    # Lane-dense tile size: last block dim must be a multiple of 128 or equal the
    # full pixel extent; ragged final tiles are masked inside the kernel.
    if hw % 128 == 0:
        tile = min(max_tile_hw, hw)
        hw_p = hw
    elif hw <= max_tile_hw:
        tile = hw
        hw_p = hw
    else:
        # Rare fallback: pad pixel axis to a multiple of 128 (targets padded with
        # ignore_index so the padded pixels contribute nothing).
        hw_p = _round_up(hw, 128)
        tile = min(max_tile_hw, hw_p)
        logits = jnp.pad(logits, ((0, 0), (0, 0), (0, hw_p - hw)))
        targets = jnp.pad(targets, ((0, 0), (0, 0), (0, hw_p - hw)),
                          constant_values=ignore_index)
    num_tiles = pl.cdiv(hw_p, tile)

    kernel = functools.partial(
        _focal_partial_kernel,
        ignore_index=int(ignore_index),
        hw=int(hw),
        tile_hw=int(tile),
    )

    dtype_bytes = jnp.dtype(logits.dtype).itemsize
    cost = pl.CostEstimate(
        flops=6 * n * hw * c,
        transcendentals=n * hw * (c + 1),
        bytes_accessed=n * c * hw_p * dtype_bytes + n * hw_p * 4 + 2 * n * tile * 4,
    )

    sums, counts = pl.pallas_call(
        kernel,
        grid=(n, num_tiles),
        in_specs=[
            pl.BlockSpec((1, c, tile), lambda i, j: (i, 0, j)),
            pl.BlockSpec((1, 1, tile), lambda i, j: (i, 0, j)),
        ],
        out_specs=[
            pl.BlockSpec((1, 1, tile), lambda i, j: (i, 0, 0)),
            pl.BlockSpec((1, 1, tile), lambda i, j: (i, 0, 0)),
        ],
        out_shape=[
            jax.ShapeDtypeStruct((n, 1, tile), jnp.float32),
            jax.ShapeDtypeStruct((n, 1, tile), jnp.float32),
        ],
        compiler_params=pltpu.CompilerParams(
            dimension_semantics=("parallel", "arbitrary"),
            vmem_limit_bytes=32 * 1024 * 1024,
        ),
        cost_estimate=cost,
    )(logits, targets)

    total = jnp.sum(sums)
    count = jnp.sum(counts)
    # NOTE: if every pixel has target == ignore_index, count == 0 and this yields
    # NaN, matching torch.nn.CrossEntropyLoss(ignore_index=...) behavior.
    ce = total / count

    # focal transform on the scalar CE loss (exactly as the PyTorch module does)
    pt = jnp.exp(-ce)
    if isinstance(gamma, int) and not isinstance(gamma, bool) and gamma >= 0:
        focal_w = jnp.float32(1.0)
        for _ in range(gamma):            # explicit repeated multiply, no pow lowering
            focal_w = focal_w * (1.0 - pt)
    else:
        focal_w = (1.0 - pt) ** gamma
    return focal_w * ce * jnp.float32(alpha)


def _focal_loss_ref(logits_nchw, targets_nhw, *, alpha=0.25, gamma=2, ignore_index=6):
    # Pure-JAX reference for correctness checking.
    n, c, h, w = logits_nchw.shape
    x = jnp.transpose(logits_nchw, (0, 2, 3, 1)).reshape(-1, c).astype(jnp.float32)
    t = targets_nhw.reshape(-1).astype(jnp.int32)
    lse = jax.scipy.special.logsumexp(x, axis=-1)
    x_t = jnp.take_along_axis(x, t[:, None], axis=-1)[:, 0]
    valid = (t != ignore_index).astype(jnp.float32)
    ce = jnp.sum((lse - x_t) * valid) / jnp.sum(valid)
    pt = jnp.exp(-ce)
    return ((1.0 - pt) ** gamma) * ce * alpha


if __name__ == "__main__":
    key = jax.random.PRNGKey(0)
    k1, k2, k3, k4 = jax.random.split(key, 4)

    # num_classes = 7 (class 6 is the ignore_index), small spatial size
    N, C, H, W = 2, 7, 16, 16
    logits = jax.random.normal(k1, (N, C, H, W), dtype=jnp.float32)
    targets = jax.random.randint(k2, (N, H, W), 0, C, dtype=jnp.int32)  # includes class 6

    # 1) f32, single pixel tile per image
    out = jax.block_until_ready(focal_loss(logits, targets, alpha=0.25, gamma=2))
    ref = _focal_loss_ref(logits, targets, alpha=0.25, gamma=2)
    assert jnp.allclose(out, ref, rtol=1e-5, atol=1e-5), (out, ref)

    # 2) multi-tile accumulation path (forces 2 pixel tiles per image)
    out2 = jax.block_until_ready(focal_loss(logits, targets, max_tile_hw=128))
    assert jnp.allclose(out2, ref, rtol=1e-5, atol=1e-5), (out2, ref)

    # 3) bf16 logits (kernel casts to f32 internally; halves HBM traffic)
    logits_bf16 = logits.astype(jnp.bfloat16)
    out3 = jax.block_until_ready(focal_loss(logits_bf16, targets))
    ref3 = _focal_loss_ref(logits_bf16, targets)
    assert jnp.allclose(out3, ref3, rtol=1e-4, atol=1e-4), (out3, ref3)

    # 4) ragged final tile (hw=384, tile=256 -> second tile masked in-kernel)
    logits_r = jax.random.normal(k3, (1, C, 16, 24), dtype=jnp.float32)
    targets_r = jax.random.randint(k4, (1, 16, 24), 0, C, dtype=jnp.int32)
    out4 = jax.block_until_ready(focal_loss(logits_r, targets_r, max_tile_hw=256))
    ref4 = _focal_loss_ref(logits_r, targets_r)
    assert jnp.allclose(out4, ref4, rtol=1e-5, atol=1e-5), (out4, ref4)

    print("KERNEL_OK")
</pallas_src>

<mosaic_0001>
module attributes {stable_mosaic.version = 11 : i64} {
  func.func @_focal_partial_kernel(%arg0: i32, %arg1: i32, %arg2: memref<1x7x256xf32, #tpu.memory_space<vmem>>, %arg3: memref<1x1x256xi32, #tpu.memory_space<vmem>>, %arg4: memref<1x1x256xf32, #tpu.memory_space<vmem>>, %arg5: memref<1x1x256xf32, #tpu.memory_space<vmem>>) attributes {dimension_semantics = [#tpu.dimension_semantics<parallel>, #tpu.dimension_semantics<arbitrary>], iteration_bounds = array<i64: 2, 1>, scalar_prefetch = 0 : i64, scratch_operands = 0 : i64, tpu.core_type = #tpu.core_type<tc>, window_params = [{transform_indices = @transform_0, window_bounds = array<i64: 1, 7, 256>}, {transform_indices = @transform_1, window_bounds = array<i64: 1, 1, 256>}, {transform_indices = @transform_2, window_bounds = array<i64: 1, 1, 256>}, {transform_indices = @transform_3, window_bounds = array<i64: 1, 1, 256>}]} {
    %c0_i32 = arith.constant 0 : i32
    %0 = arith.cmpi eq, %arg1, %c0_i32 : i32
    %1 = arith.extui %0 : i1 to i32
    %c0_i32_0 = arith.constant 0 : i32
    %2 = arith.cmpi ne, %1, %c0_i32_0 : i32
    scf.if %2 {
      %cst_23 = arith.constant 0.000000e+00 : f32
      %45 = vector.broadcast %cst_23 : f32 to vector<1x1x256xf32>
      %c0_24 = arith.constant 0 : index
      %c0_25 = arith.constant 0 : index
      %c0_26 = arith.constant 0 : index
      %46 = vector.load %arg4[%c0_24, %c0_25, %c0_26] : memref<1x1x256xf32, #tpu.memory_space<vmem>>, vector<1x1x256xf32>
      tpu.vector_store %arg4[%c0_24, %c0_25, %c0_26], %45 {strides = array<i32>} : memref<1x1x256xf32, #tpu.memory_space<vmem>>, vector<1x1x256xf32>,
      %cst_27 = arith.constant 0.000000e+00 : f32
      %47 = vector.broadcast %cst_27 : f32 to vector<1x1x256xf32>
      %c0_28 = arith.constant 0 : index
      %c0_29 = arith.constant 0 : index
      %c0_30 = arith.constant 0 : index
      %48 = vector.load %arg5[%c0_28, %c0_29, %c0_30] : memref<1x1x256xf32, #tpu.memory_space<vmem>>, vector<1x1x256xf32>
      tpu.vector_store %arg5[%c0_28, %c0_29, %c0_30], %47 {strides = array<i32>} : memref<1x1x256xf32, #tpu.memory_space<vmem>>, vector<1x1x256xf32>,
    } else {
    }
    %c0 = arith.constant 0 : index
    %c0_1 = arith.constant 0 : index
    %c0_2 = arith.constant 0 : index
    %3 = vector.load %arg2[%c0, %c0_1, %c0_2] : memref<1x7x256xf32, #tpu.memory_space<vmem>>, vector<1x7x256xf32>
    %4 = vector.shape_cast %3 : vector<1x7x256xf32> to vector<7x256xf32>
    %c0_3 = arith.constant 0 : index
    %c0_4 = arith.constant 0 : index
    %c0_5 = arith.constant 0 : index
    %5 = vector.load %arg3[%c0_3, %c0_4, %c0_5] : memref<1x1x256xi32, #tpu.memory_space<vmem>>, vector<1x1x256xi32>
    %6 = vector.shape_cast %5 : vector<1x1x256xi32> to vector<1x256xi32>
    %cst = arith.constant dense<0xFF800000> : vector<256xf32>
    %7 = vector.multi_reduction <maximumf>, %4, %cst [0] : vector<7x256xf32> to vector<256xf32>
    %8 = vector.shape_cast %7 : vector<256xf32> to vector<1x256xf32>
    %9 = vector.broadcast %8 : vector<1x256xf32> to vector<7x256xf32>
    %10 = arith.subf %4, %9 : vector<7x256xf32>
    %11 = math.exp %10 : vector<7x256xf32>
    %cst_6 = arith.constant dense<0.000000e+00> : vector<256xf32>
    %12 = vector.multi_reduction <add>, %11, %cst_6 [0] : vector<7x256xf32> to vector<256xf32>
    %13 = vector.shape_cast %12 : vector<256xf32> to vector<1x256xf32>
    %14 = math.log %13 : vector<1x256xf32>
    %15 = arith.addf %8, %14 : vector<1x256xf32>
    %16 = tpu.iota {dimensions = array<i32: 0>} : vector<7x256xi32>
    %17 = vector.broadcast %6 : vector<1x256xi32> to vector<7x256xi32>
    %18 = arith.cmpi eq, %16, %17 : vector<7x256xi32>
    %cst_7 = arith.constant 0.000000e+00 : f32
    %19 = vector.broadcast %cst_7 : f32 to vector<7x256xf32>
    %20 = arith.select %18, %4, %19 : vector<7x256xi1>, vector<7x256xf32>
    %cst_8 = arith.constant dense<0.000000e+00> : vector<256xf32>
    %21 = vector.multi_reduction <add>, %20, %cst_8 [0] : vector<7x256xf32> to vector<256xf32>
    %22 = vector.shape_cast %21 : vector<256xf32> to vector<1x256xf32>
    %c256_i32 = arith.constant 256 : i32
    %23 = arith.muli %arg1, %c256_i32 : i32
    %24 = tpu.iota {dimensions = array<i32: 1>} : vector<1x256xi32>
    %25 = vector.broadcast %23 : i32 to vector<1x256xi32>
    %26 = arith.addi %25, %24 : vector<1x256xi32>
    %c6_i32 = arith.constant 6 : i32
    %27 = vector.broadcast %c6_i32 : i32 to vector<1x256xi32>
    %28 = arith.cmpi ne, %6, %27 : vector<1x256xi32>
    %c256_i32_9 = arith.constant 256 : i32
    %29 = vector.broadcast %c256_i32_9 : i32 to vector<1x256xi32>
    %30 = arith.cmpi slt, %26, %29 : vector<1x256xi32>
    %31 = arith.andi %28, %30 : vector<1x256xi1>
    %32 = arith.subf %15, %22 : vector<1x256xf32>
    %cst_10 = arith.constant 0.000000e+00 : f32
    %33 = vector.broadcast %cst_10 : f32 to vector<1x256xf32>
    %34 = arith.select %31, %32, %33 : vector<1x256xi1>, vector<1x256xf32>
    %c0_11 = arith.constant 0 : index
    %c0_12 = arith.constant 0 : index
    %c0_13 = arith.constant 0 : index
    %35 = vector.load %arg4[%c0_11, %c0_12, %c0_13] : memref<1x1x256xf32, #tpu.memory_space<vmem>>, vector<1x1x256xf32>
    %36 = vector.shape_cast %34 : vector<1x256xf32> to vector<1x1x256xf32>
    %37 = arith.addf %35, %36 : vector<1x1x256xf32>
    %c0_14 = arith.constant 0 : index
    %c0_15 = arith.constant 0 : index
    %c0_16 = arith.constant 0 : index
    %38 = vector.load %arg4[%c0_14, %c0_15, %c0_16] : memref<1x1x256xf32, #tpu.memory_space<vmem>>, vector<1x1x256xf32>
    tpu.vector_store %arg4[%c0_14, %c0_15, %c0_16], %37 {strides = array<i32>} : memref<1x1x256xf32, #tpu.memory_space<vmem>>, vector<1x1x256xf32>,
    %c0_17 = arith.constant 0 : index
    %c0_18 = arith.constant 0 : index
    %c0_19 = arith.constant 0 : index
    %39 = vector.load %arg5[%c0_17, %c0_18, %c0_19] : memref<1x1x256xf32, #tpu.memory_space<vmem>>, vector<1x1x256xf32>
    %40 = arith.extui %31 : vector<1x256xi1> to vector<1x256xi32>
    %41 = arith.sitofp %40 : vector<1x256xi32> to vector<1x256xf32>
    %42 = vector.shape_cast %41 : vector<1x256xf32> to vector<1x1x256xf32>
    %43 = arith.addf %39, %42 : vector<1x1x256xf32>
    %c0_20 = arith.constant 0 : index
    %c0_21 = arith.constant 0 : index
    %c0_22 = arith.constant 0 : index
    %44 = vector.load %arg5[%c0_20, %c0_21, %c0_22] : memref<1x1x256xf32, #tpu.memory_space<vmem>>, vector<1x1x256xf32>
    tpu.vector_store %arg5[%c0_20, %c0_21, %c0_22], %43 {strides = array<i32>} : memref<1x1x256xf32, #tpu.memory_space<vmem>>, vector<1x1x256xf32>,
    return
  }
  func.func @transform_0(%arg0: i32, %arg1: i32) -> (i32, i32, i32) {
    %c0_i32 = arith.constant 0 : i32
    %c0_i32_0 = arith.constant 0 : i32
    return %arg0, %c0_i32, %arg1 : i32, i32, i32
  }
  func.func @transform_1(%arg0: i32, %arg1: i32) -> (i32, i32, i32) {
    %c0_i32 = arith.constant 0 : i32
    %c0_i32_0 = arith.constant 0 : i32
    return %arg0, %c0_i32, %arg1 : i32, i32, i32
  }
  func.func @transform_2(%arg0: i32, %arg1: i32) -> (i32, i32, i32) {
    %c0_i32 = arith.constant 0 : i32
    %c0_i32_0 = arith.constant 0 : i32
    %c0_i32_1 = arith.constant 0 : i32
    return %arg0, %c0_i32, %c0_i32_0 : i32, i32, i32
  }
  func.func @transform_3(%arg0: i32, %arg1: i32) -> (i32, i32, i32) {
    %c0_i32 = arith.constant 0 : i32
    %c0_i32_0 = arith.constant 0 : i32
    %c0_i32_1 = arith.constant 0 : i32
    return %arg0, %c0_i32, %c0_i32_0 : i32, i32, i32
  }
}

</mosaic_0001>

<bundles_post_ra>
// kernel: tpu_custom_call.1
= control target key start
LH: loop header
LB: loop body
LE: loop exit
PB: predicated region body
PF: predicated region fallthrough
CT: control target
= control target key end

     0   :  { %9 = vsyncpa [#allocation3], 0  ;;  %s990_s0 = inlined_call_operand.vmem [shape: f32[2,7,256], index: 0, kind: input, shape index: {}]   ;;  %s991_s1 = inlined_call_operand.vmem [shape: s32[2,1,256], index: 1, kind: input, shape index: {}]   ;;  %s992_s2 = inlined_call_operand.hbm [shape: f32[2,1,256], index: 2, kind: output, shape index: {0}]   ;;  %s993_s3 = inlined_call_operand.hbm [shape: f32[2,1,256], index: 3, kind: output, shape index: {1}]  }
   0x1   :  { %11 = vsyncpa [#allocation3 + $0x1], 0 }
   0x2   :  { %12 = vsyncpa [#allocation5], 0 }
   0x3   :  { %14 = vsyncpa [#allocation5 + $0x1], 0  ;;  %s769_s12 = smov 0   ;;  %s771_s13 = smov 0  }
   0x4   :  { %s773_s14 = smov 0   ;;  %s775_s15 = smov 0  }
   0x5   :  { %s777_s16 = smov 0   ;;  %s779_s17 = smov 0  }
   0x6 LB: > { %s539_s18 = sadd.s32 4294967295, %s742_s17   ;;  %s540_s19 = sadd.s32 4294967294, %s742_s17   ;;  %s742_s17 = sphi %s779_s17, %s20_s17   ;;  %s738_s16 = sphi %s777_s16, %s1004_s16   ;;  %s734_s15 = sphi %s775_s15, %s1003_s15   ;;  %s730_s14 = sphi %s773_s14, %s1002_s14   ;;  %s726_s13 = sphi %s771_s13, %s1001_s13   ;;  %s722_s12 = sphi %s769_s12, %s1000_s12  }
   0x7   : > { %s32_s20 = sadd.s32 1, %s738_s16  ;;  %s95_s21 = sadd.s32 1, %s730_s14 }
   0x8   : > { %p34_p0 = scmp.ge.s32.totalorder %s32_s20, 2  ;;  %p105_p1 = scmp.ne.s32.totalorder %s730_s14, %s726_s13 }
   0x9   : > { %p106_p2 = scmp.eq.s32.totalorder %s539_s18, 1  ;;  %p111_p3 = scmp.ne.s32.totalorder %s726_s13, %s722_s12 }
   0xa   : > { %s1006_s20 = smov (%p34_p0, %s32_s20), 0  ;;  %p112_p5 = scmp.eq.s32.totalorder %s540_s19, 1 }
   0xb   : > { %p809_p4 = por %p106_p2, %p105_p1  ;;  %s92_s23 = ssub.s32 %s738_s16, %s1006_s20 }
   0xc   : > { %p543_p6 = scmp.ge.s32.totalorder %s742_s17, 1  ;;  %p93_p7 = scmp.eq.s32.totalorder %s92_s23, 0 }
   0xd   : > { %p816_p8 = por %p112_p5, %p111_p3  ;;  %p181_p9 = scmp.lt.s32.totalorder %s742_s17, 3 }
   0xe   : > { %s822_s25 = scalar_select %p93_p7, %s730_s14, %s95_s21  }
   0xf   : > { %p182_p10 = pnand %p543_p6, %p181_p9 }
  0x10   : > { %s825_s26 = sand.u32 (!%p182_p10), 1, %s726_s13   ;;  %p223_p11 = scmp.lt.s32.totalorder (!%p182_p10), %s734_s15, 1  ;;  %v245_v0 = vlaneseq (!%p182_p10)  ;;  %v744_v2 = vmov (!%p182_p10), 1966171168   ;;  %v745_v4 = vmov (!%p182_p10), 0.0   ;;  %vm254_vm1 = vcmask (!%p182_p10), 1046528  }
  0x11   : > { %185 = sbr.rel (%p182_p10) target bundleno = 122 (0x7a), region = 28  ;;  %s544_s27 = sshll.u32 (!%p182_p10), %s825_s26, 1  ;;  %v337_v3 = vunpack.c.l.s4 (!%p182_p10), %v744_v2  ;;  %v746_v7 = vmov (!%p182_p10), 1  }
  0x12   : > { %vm829_vm0 = vcmp.lt.s32.totalorder (!%p182_p10), %v245_v0, 256  ;;  %s834_s29 = scalar_lea.vmem (!%p182_p10), [#allocation2], %s544_s27  ;;  %s839_s30 = scalar_lea.vmem (!%p182_p10), [#allocation4], %s544_s27  ;;  %v844_v5 = vshrl.u32 (!%p182_p10), %v245_v0, 7  ;;  %v335_v8 = vcombine.low (!%p182_p10), %v746_v7, %v746_v7 }
  0x13   : > { %249 = vst.msk [vmem:[%s834_s29] sm:$0x3] (!%p182_p10), %vm829_vm0, %v745_v4  ;;  %250 = vst.msk [vmem:[%s839_s30] sm:$0x3] (!%p182_p10), %vm829_vm0, %v745_v4  ;;  %v338_v6 = vunpack.c.0.s8 (!%p182_p10), %v337_v3  ;;  %s559_s18 = sshll.u32 (!%p182_p10), %s734_s15, 5  ;;  %s419_s19 = sshll.u32 (!%p182_p10), %s839_s30, 4  ;;  %s881_s19 = int_to_ptr.vmem [resolvable:$true] %s419_s19 }
  0x14   : > { %s879_s27 = scalar_lea.hbm (!%p182_p10), %s993_s3, %s559_s18 }
  0x15   : > { %v850_v9 = vsub.s32 (!%p182_p10), %v338_v6, %v844_v5 }
  0x17   : > { %v342_v16 = vrot.slane (!%p182_p10), %v335_v8, %v850_v9 }
  0x18   : > { %s224_s28 = scalar_select %p223_p11, %s734_s15, 1 }
  0x19   : > { %v349_v20 = vrot.slane %v342_v16, %v850_v9 }
  0x1a   : > { %s558_s4 = sshll.u32 %s224_s28, 4  ;;  %s548_s5 = sshll.u32 %s224_s28, 1  ;;  %v380_v26 = vld [vmem:[%s839_s30] sm:$0x3] }
  0x1b   : > { %s230_s8 = scalar_lea.vmem %s990_s0, %s558_s4  ;;  %s239_s11 = scalar_lea.vmem %s991_s1, %s548_s5  ;;  %vm350_vm3 = vcmp.ne.s32.totalorder %v349_v20, 0 }
  0x1c   : > { %v852_v10 = vld [vmem:[%s230_s8] sm:$0x7f]  ;;  %v854_v11 = vld [vmem:[%s230_s8 + $0x8] sm:$0x7f]  ;;  %s391_s28 = scalar_lea.sflag [#allocation5], %s825_s26  ;;  %s632_s4 = scalar_lea.vmem %s881_s19, 32 }
  0x1d   : > { %v255_v12 = vsel %vm254_vm1, %v852_v10, -inf  ;;  %v262_v13 = vsel %vm254_vm1, %v854_v11, -inf  ;;  %v253_v17 = vld [vmem:[%s239_s11] sm:$0x3]  ;;  %p633_p12 = scmp.ne.s32.totalorder %s881_s19, %s632_s4  ;;  %s747_s5 = smov [#allocation4]  }
  0x1e   : > { %v256_v14 = vrot.slane %v255_v12, 4  ;;  %v263_v15 = vrot.slane %v262_v13, 4  ;;  %vm330_vm2 = vcmp.ne.s32.totalorder %v253_v17, 6  ;;  %s636_s6 = sshll.u32 %s747_s5, 4  ;;  %s637_s6 = int_to_ptr.vmem [resolvable:$false] %s636_s6 }
  0x1f   : > { %vm865_vm4 = vmand %vm330_vm2, %vm350_vm3  ;;  %p634_p13 = pnand %p633_p12, %p809_p4  ;;  %s638_s7 = scalar_lea.vmem %s637_s6, 64 }
  0x20   : > { %v257_v18 = vmax.f32 %v255_v12, %v256_v14  ;;  %v264_v19 = vmax.f32 %v262_v13, %v263_v15  ;;  %v549_v27 = vsel %vm865_vm4, 1.0, %v745_v4  ;;  %p639_p1 = scmp.lt.s32.totalorder %s881_s19, %s637_s6  ;;  %p640_p2 = scmp.lt.s32.totalorder %s638_s7, %s632_s4 }
  0x21   : > { %v383_v30 = vadd.f32 %v549_v27, %v380_v26  ;;  %p635_p0 = pneg %p634_p13 }
  0x22   : > { %v258_v21 = vrot.slane %v257_v18, 2  ;;  %v265_v22 = vrot.slane %v264_v19, 2  ;;  %p641_p3 = por %p640_p2, %p639_p1 }
  0x23   : > { %384 = vst.msk [vmem:[%s839_s30] sm:$0x3] %vm829_vm0, %v383_v30 }
  0x24   : > { %v259_v23 = vmax.f32 %v257_v18, %v258_v21  ;;  %v266_v24 = vmax.f32 %v264_v19, %v265_v22  ;;  %p642_p5 = pnand %p641_p3, %p635_p0 }
  0x26   : > { %v260_v28 = vrot.slane %v259_v23, 1  ;;  %v267_v29 = vrot.slane %v266_v24, 1 }
  0x28   : > { %v883_v31 = vmax.f32 %v259_v23, %v260_v28  ;;  %v885_v32 = vmax.f32 %v266_v24, %v267_v29 }
  0x2a   : > { %v269_v33 = vsub.f32 %v852_v10, %v883_v31  ;;  %v270_v34 = vsub.f32 %v854_v11, %v885_v32 }
  0x2b   : > { %645 = shalt.err (!%p642_p5)
}
  0x2c   : > { %s646_s30 = scalar_lea.hbm %s879_s27, 32  ;;  %s650_s10 = scalar_lea.hbm %s993_s3, 64 }
  0x2d   : > { %p647_p6 = scmp.ne.s32.totalorder %s879_s27, %s646_s30  ;;  %p651_p10 = scmp.lt.u32.totalorder %s879_s27, %s993_s3 }
  0x2e   : > { %p652_p11 = scmp.lt.u32.totalorder %s650_s10, %s646_s30  ;;  %p654_p13 = scmp.lt.u32.totalorder %s646_s30, %s879_s27 }
  0x2f   : > { %p648_p7 = pnand %p647_p6, %p809_p4 }
  0x30   : > { %p653_p12 = por %p652_p11, %p651_p10 }
  0x31   : > { %p649_p9 = pneg %p648_p7 }
  0x32   : > { %p655_p0 = por %p654_p13, %p653_p12 }
  0x34   : > { %p656_p1 = pnand %p655_p0, %p649_p9 }
  0x36   : > { %659 = shalt.err (!%p656_p1)
}
  0x37   : > { %562 = dma.vmem_to_hbm [thread:$0]  (%p809_p4), %s881_s19, 32, %s879_s27, %s391_s28   ;;  %v271_v35 = vmul.f32 1.442695, %v269_v33  ;;  %v273_v36 = vmul.f32 1.442695, %v270_v34  ;;  %v299_v37 = vsub.s32 0, %v844_v5 }
  0x38   : > { %v303_v38 = vsub.s32 1, %v844_v5  ;;  %v373_v22 = vld [vmem:[%s834_s29] sm:$0x3]  ;;  %s405_s19 = sshll.u32 %s834_s29, 4  ;;  %s939_s28 = scalar_lea.hbm %s992_s2, %s559_s18  ;;  %s941_s19 = int_to_ptr.vmem [resolvable:$true] %s405_s19 }
  0x39   : > { %624 = vpow2.f32 %v271_v35  ;;  %v300_v39 = vrot.slane %v253_v17, %v299_v37  ;;  %s386_s4 = scalar_lea.sflag [#allocation3], %s825_s26  ;;  %s660_s5 = scalar_lea.vmem %s941_s19, 32 }
  0x3a   : > { %626 = vpow2.f32 %v273_v36  ;;  %v304_v40 = vrot.slane %v253_v17, %v303_v38  ;;  %p661_p2 = scmp.ne.s32.totalorder %s941_s19, %s660_s5  ;;  %s748_s15 = smov [#allocation2]  }
  0x3b   : > { %vm305_vm5 = vcmp.eq.s32.totalorder %v844_v5, %v300_v39  ;;  %s664_s6 = sshll.u32 %s748_s15, 4  ;;  %s665_s6 = int_to_ptr.vmem [resolvable:$false] %s664_s6 }
  0x3c   : > { %vm306_vm6 = vcmp.eq.s32.totalorder %v844_v5, %v304_v40  ;;  %v307_v41 = vsel %vm305_vm5, %v852_v10, 0.0  ;;  %p662_p3 = pnand %p661_p2, %p809_p4  ;;  %s666_s7 = scalar_lea.vmem %s665_s6, 64 }
  0x3d   : > { %v308_v43 = vsel %vm306_vm6, %v854_v11, 0.0  ;;  %v309_v48 = vsel %vm254_vm1, %v307_v41, 0.0  ;;  %p667_p6 = scmp.lt.s32.totalorder %s941_s19, %s665_s6  ;;  %p668_p7 = scmp.lt.s32.totalorder %s666_s7, %s660_s5 }
  0x3e   : > { %v316_v50 = vsel %vm254_vm1, %v308_v43, 0.0  ;;  %v310_v53 = vrot.slane %v309_v48, 4  ;;  %p663_p5 = pneg %p662_p3 }
  0x3f   : > { %v317_v55 = vrot.slane %v316_v50, 4  ;;  %p669_p9 = por %p668_p7, %p667_p6 }
  0x40   : > { %v311_v59 = vadd.f32 %v310_v53, %v309_v48 }
  0x41   : > { %v318_v61 = vadd.f32 %v317_v55, %v316_v50  ;;  %p670_p10 = pnand %p669_p9, %p663_p5 }
  0x42   : > { %v312_v2 = vrot.slane %v311_v59, 2 }
  0x43   : > { %v625_v42 = vpop.eup %624  ;;  %v319_v3 = vrot.slane %v318_v61, 2 }
  0x44   : > { %v627_v44 = vpop.eup %626  ;;  %v275_v45 = vsel %vm254_vm1, %v625_v42, 0.0  ;;  %v313_v4 = vadd.f32 %v312_v2, %v311_v59 }
  0x45   : > { %v276_v46 = vrot.slane %v275_v45, 4  ;;  %v282_v47 = vsel %vm254_vm1, %v627_v44, 0.0  ;;  %v320_v5 = vadd.f32 %v319_v3, %v318_v61 }
  0x46   : > { %v283_v49 = vrot.slane %v282_v47, 4  ;;  %v314_v6 = vrot.slane %v313_v4, 1 }
  0x47   : > { %v277_v51 = vadd.f32 %v276_v46, %v275_v45  ;;  %v321_v7 = vrot.slane %v320_v5, 1 }
  0x48   : > { %v284_v52 = vadd.f32 %v283_v49, %v282_v47  ;;  %v315_v12 = vadd.f32 %v314_v6, %v313_v4 }
  0x49   : > { %v278_v54 = vrot.slane %v277_v51, 2  ;;  %v322_v14 = vadd.f32 %v321_v7, %v320_v5 }
  0x4a   : > { %v285_v56 = vrot.slane %v284_v52, 2 }
  0x4b   : > { %v279_v57 = vadd.f32 %v278_v54, %v277_v51 }
  0x4c   : > { %v286_v58 = vadd.f32 %v285_v56, %v284_v52 }
  0x4d   : > { %v280_v60 = vrot.slane %v279_v57, 1 }
  0x4e   : > { %v287_v62 = vrot.slane %v286_v58, 1 }
  0x4f   : > { %v281_v63 = vadd.f32 %v280_v60, %v279_v57 }
  0x50   : > { %v288_v0 = vadd.f32 %v287_v62, %v286_v58 }
  0x51   : > { %628 = vlog2.f32 %v281_v63 }
  0x52   : > { %630 = vlog2.f32 %v288_v0 }
  0x5b   : > { %v629_v8 = vpop.eup %628 }
  0x5c   : > { %v631_v10 = vpop.eup %630  ;;  %v290_v11 = vmul.f32 0.6931472, %v629_v8 }
  0x5d   : > { %v292_v13 = vmul.f32 0.6931472, %v631_v10 }
  0x5e   : > { %v293_v15 = vadd.f32 %v290_v11, %v883_v31 }
  0x5f   : > { %v294_v16 = vadd.f32 %v292_v13, %v885_v32 }
  0x60   : > { %v352_v17 = vsub.f32 %v293_v15, %v315_v12 }
  0x61   : > { %v353_v18 = vsub.f32 %v294_v16, %v322_v14 }
  0x63   : > { %v356_v19 = vcombine.low %v352_v17, %v353_v18 }
  0x65   : > { %v363_v20 = vrot.slane %v356_v19, %v850_v9 }
  0x67   : > { %v370_v21 = vrot.slane %v363_v20, %v850_v9 }
  0x69   : > { %v372_v23 = vsel %vm865_vm4, %v370_v21, 0.0 }
  0x6a   : > { %v374_v24 = vadd.f32 %v373_v22, %v372_v23 }
  0x6c   : > { %379 = vst.msk [vmem:[%s834_s29] sm:$0x3] %vm829_vm0, %v374_v24 }
  0x6d   : > { %673 = shalt.err (!%p670_p10)
}
  0x6e   : > { %s674_s26 = scalar_lea.hbm %s939_s28, 32  ;;  %s678_s30 = scalar_lea.hbm %s992_s2, 64 }
  0x6f   : > { %p675_p11 = scmp.ne.s32.totalorder %s939_s28, %s674_s26  ;;  %p679_p0 = scmp.lt.u32.totalorder %s939_s28, %s992_s2 }
  0x70   : > { %p680_p1 = scmp.lt.u32.totalorder %s678_s30, %s674_s26  ;;  %p682_p3 = scmp.lt.u32.totalorder %s674_s26, %s939_s28 }
  0x71   : > { %p676_p12 = pnand %p675_p11, %p809_p4 }
  0x72   : > { %p681_p2 = por %p680_p1, %p679_p0 }
  0x73   : > { %p677_p13 = pneg %p676_p12 }
  0x74   : > { %p683_p5 = por %p682_p3, %p681_p2 }
  0x76   : > { %p684_p6 = pnand %p683_p5, %p677_p13 }
  0x78   : > { %687 = shalt.err (!%p684_p6)
}
  0x79   : > { %561 = dma.vmem_to_hbm [thread:$0]  (%p809_p4), %s941_s19, 32, %s939_s28, %s386_s4  }
  0x7a PF: > { %p572_p7 = scmp.ge.s32.totalorder %s742_s17, 2  ;;  %s431_s10 = sand.u32 1, %s722_s12  }
  0x7b   : > { %s432_s11 = scalar_lea.sflag [#allocation3], %s431_s10 }
  0x7c   : > { %p566_p9 = pnand %p572_p7, %p816_p8 }
  0x7e   : > { %713 = dma.done.wait (!%p566_p9), %s432_s11, 32  }
  0x7f   : > { %715 = vsyncadd (!%p566_p9), %s432_s11, 4294967264  ;;  %s441_s21 = scalar_lea.sflag [#allocation5], %s431_s10 }
  0x80   : > { %717 = dma.done.wait (!%p566_p9), %s441_s21, 32  }
  0x81   : > { %719 = vsyncadd (!%p566_p9), %s441_s21, 4294967264  ;;  %s20_s17 = sadd.s32 1, %s742_s17   ;;  %s1000_s12 = smov %s726_s13 }
  0x82   : > { %p17_p10 = scmp.ge.s32.totalorder %s20_s17, 4   ;;  %s1001_s13 = smov %s730_s14 }
  0x83   : > { %s1002_s14 = smov %s822_s25  ;;  %s1003_s15 = smov %s738_s16 }
  0x84   : > { %s1004_s16 = smov %s1006_s20  ;;  %19 = sbr.rel (!%p17_p10) target bundleno = 6 (0x6), region = 87 }
  0x8b   :  { %446 = vsyncpa [#allocation3], 1 }
  0x8c   :  { %448 = vsyncpa [#allocation3 + $0x1], 1 }
  0x8d   :  { %449 = vsyncpa [#allocation5], 1 }
  0x8e   :  { %451 = vsyncpa [#allocation5 + $0x1], 1 }

</bundles_post_ra>
